<compile_context>
chip_gen: v6e
topology: v6e:2x2x1
jax: 0.10.0
libtpu: 0.0.40
codegen_flags: <defaults>
</compile_context>

<pallas_src>
import functools

import jax
import jax.numpy as jnp
from jax.experimental import pallas as pl
from jax.experimental.pallas import tpu as pltpu


# ---------------------------------------------------------------------------
# Shared in-kernel math for one GRU step (operates on loaded arrays).
# ---------------------------------------------------------------------------
def _gru_step(x, h, wx, wh, bias_x, c_h, w_o, b_o, *, hidden, out_dim):
    """x: (B, Ip); h: (B, Hp) f32; wx: (Ip, 3Hp); wh: (Hp, 3Hp); returns
    (softmax probs (B, Op) f32, h_new (B, Hp) f32)."""
    wd = wx.dtype  # compute matmuls in the weight dtype (bf16 or f32), acc f32
    gx = jnp.dot(x.astype(wd), wx, preferred_element_type=jnp.float32) + bias_x
    gh = jnp.dot(h.astype(wd), wh, preferred_element_type=jnp.float32)

    H = hidden
    update_gate = jax.nn.sigmoid(gx[:, :H] + gh[:, :H])
    reset_gate = jax.nn.sigmoid(gx[:, H:2 * H] + gh[:, H:2 * H])
    h_candidate = jnp.tanh(gx[:, 2 * H:] + reset_gate * (gh[:, 2 * H:] + c_h))
    h_new = update_gate * h + (1.0 - update_gate) * h_candidate

    # Output head + softmax over the (padded) feature axis; mask padded lanes.
    logits = jnp.dot(h_new.astype(wd), w_o, preferred_element_type=jnp.float32) + b_o
    col = jax.lax.broadcasted_iota(jnp.int32, logits.shape, 1)
    logits = jnp.where(col < out_dim, logits, -1e30)
    m = jnp.max(logits, axis=1, keepdims=True)
    e = jnp.exp(logits - m)
    probs = e * pl.reciprocal(jnp.sum(e, axis=1, keepdims=True), approx=True)
    return probs, h_new


# ---------------------------------------------------------------------------
# Kernels
# ---------------------------------------------------------------------------
def _gru_cell_kernel(x_ref, h_ref, wx_ref, wh_ref, bx_ref, ch_ref, wo_ref, bo_ref,
                     out_ref, hnew_ref, *, hidden, out_dim):
    probs, h_new = _gru_step(
        x_ref[...], h_ref[...].astype(jnp.float32),
        wx_ref[...], wh_ref[...],
        bx_ref[...].astype(jnp.float32), ch_ref[...].astype(jnp.float32),
        wo_ref[...], bo_ref[...].astype(jnp.float32),
        hidden=hidden, out_dim=out_dim)
    out_ref[...] = probs.astype(out_ref.dtype)
    hnew_ref[...] = h_new.astype(hnew_ref.dtype)


def _gru_seq_kernel(x_ref, h0_ref, wx_ref, wh_ref, bx_ref, ch_ref, wo_ref, bo_ref,
                    out_ref, hlast_ref, h_scr, *, hidden, out_dim):
    """Time loop lives in the grid; h is carried in a VMEM scratch accumulator,
    weights are DMA'd once (constant index_maps) and stay VMEM-resident."""
    t = pl.program_id(0)

    @pl.when(t == 0)
    def _():
        h_scr[...] = h0_ref[...].astype(jnp.float32)

    probs, h_new = _gru_step(
        x_ref[0], h_scr[...],
        wx_ref[...], wh_ref[...],
        bx_ref[...].astype(jnp.float32), ch_ref[...].astype(jnp.float32),
        wo_ref[...], bo_ref[...].astype(jnp.float32),
        hidden=hidden, out_dim=out_dim)

    h_scr[...] = h_new
    out_ref[0] = probs.astype(out_ref.dtype)

    @pl.when(t == pl.num_programs(0) - 1)
    def _():
        hlast_ref[...] = h_new.astype(hlast_ref.dtype)


# ---------------------------------------------------------------------------
# Wrappers (padding / fusing / pallas_call setup)
# ---------------------------------------------------------------------------
def _round_up(n, m):
    return ((n + m - 1) // m) * m


def _pad2(a, rows, cols):
    return jnp.pad(a, ((0, rows - a.shape[0]), (0, cols - a.shape[1])))


def _pack_params(p, Ip, Hp, Op, weight_dtype):
    """Fuse + pad the GRU parameters for the kernel."""
    w_cat = jnp.concatenate(
        [_pad2(p["W_u"], Ip, Hp), _pad2(p["W_r"], Ip, Hp), _pad2(p["W_h"], Ip, Hp)],
        axis=1).astype(weight_dtype)                                    # (Ip, 3Hp)
    k_cat = jnp.concatenate(
        [_pad2(p["K_u"], Hp, Hp), _pad2(p["K_r"], Hp, Hp), _pad2(p["K_h"], Hp, Hp)],
        axis=1).astype(weight_dtype)                                    # (Hp, 3Hp)
    bias_cat = jnp.concatenate(
        [_pad2(p["b_u"] + p["c_u"], 1, Hp),
         _pad2(p["b_r"] + p["c_r"], 1, Hp),
         _pad2(p["b_h"], 1, Hp)], axis=1).astype(jnp.float32)           # (1, 3Hp)
    c_h = _pad2(p["c_h"], 1, Hp).astype(jnp.float32)                    # (1, Hp)
    w_o = _pad2(p["W_o"], Hp, Op).astype(weight_dtype)                  # (Hp, Op)
    b_o = _pad2(p["b_o"], 1, Op).astype(jnp.float32)                    # (1, Op)
    return w_cat, k_cat, bias_cat, c_h, w_o, b_o


def gru_cell_forward(x_t, h_prev, params, weight_dtype=jnp.bfloat16):
    """Single GRU-cell step.  x_t: (B, I), h_prev: (B, H) -> ((B, O), (B, H))."""
    B, I = x_t.shape
    H = h_prev.shape[1]
    O = params["W_o"].shape[1]

    Ip, Hp, Op = _round_up(I, 128), _round_up(H, 128), _round_up(O, 128)
    Bp = _round_up(B, 8)
    if Bp > 256:                      # tile large batches across the grid
        Bp = _round_up(Bp, 128)
        block_b = 128
    else:
        block_b = Bp

    w_cat, k_cat, bias_cat, c_h, w_o, b_o = _pack_params(params, Ip, Hp, Op,
                                                         weight_dtype)
    x_p = _pad2(x_t.astype(jnp.float32), Bp, Ip)
    h_p = _pad2(h_prev.astype(jnp.float32), Bp, Hp)

    kernel = functools.partial(_gru_cell_kernel, hidden=Hp, out_dim=O)
    out_p, hnew_p = pl.pallas_call(
        kernel,
        out_shape=(jax.ShapeDtypeStruct((Bp, Op), jnp.float32),
                   jax.ShapeDtypeStruct((Bp, Hp), jnp.float32)),
        grid=(Bp // block_b,),
        in_specs=[
            pl.BlockSpec((block_b, Ip), lambda b: (b, 0)),    # x tile
            pl.BlockSpec((block_b, Hp), lambda b: (b, 0)),    # h tile
            pl.BlockSpec((Ip, 3 * Hp), lambda b: (0, 0)),     # fused W (resident)
            pl.BlockSpec((Hp, 3 * Hp), lambda b: (0, 0)),     # fused K (resident)
            pl.BlockSpec((1, 3 * Hp), lambda b: (0, 0)),      # fused bias
            pl.BlockSpec((1, Hp), lambda b: (0, 0)),          # c_h
            pl.BlockSpec((Hp, Op), lambda b: (0, 0)),         # W_o
            pl.BlockSpec((1, Op), lambda b: (0, 0)),          # b_o
        ],
        out_specs=(pl.BlockSpec((block_b, Op), lambda b: (b, 0)),
                   pl.BlockSpec((block_b, Hp), lambda b: (b, 0))),
        compiler_params=pltpu.CompilerParams(
            dimension_semantics=("parallel",),
            vmem_limit_bytes=64 * 1024 * 1024),
    )(x_p, h_p, w_cat, k_cat, bias_cat, c_h, w_o, b_o)

    return out_p[:B, :O], hnew_p[:B, :H]


def gru_sequence_forward(x_seq, h0, params, weight_dtype=jnp.bfloat16):
    """Run the cell over a sequence with the time loop inside one kernel.
    x_seq: (T, B, I), h0: (B, H) -> ((T, B, O), (B, H))."""
    T, B, I = x_seq.shape
    H = h0.shape[1]
    O = params["W_o"].shape[1]

    Ip, Hp, Op = _round_up(I, 128), _round_up(H, 128), _round_up(O, 128)
    Bp = _round_up(B, 8)

    w_cat, k_cat, bias_cat, c_h, w_o, b_o = _pack_params(params, Ip, Hp, Op,
                                                         weight_dtype)
    x_p = jnp.pad(x_seq.astype(jnp.float32), ((0, 0), (0, Bp - B), (0, Ip - I)))
    h0_p = _pad2(h0.astype(jnp.float32), Bp, Hp)

    kernel = functools.partial(_gru_seq_kernel, hidden=Hp, out_dim=O)
    outs_p, hlast_p = pl.pallas_call(
        kernel,
        out_shape=(jax.ShapeDtypeStruct((T, Bp, Op), jnp.float32),
                   jax.ShapeDtypeStruct((Bp, Hp), jnp.float32)),
        grid=(T,),
        in_specs=[
            pl.BlockSpec((1, Bp, Ip), lambda t: (t, 0, 0)),   # x_t slab
            pl.BlockSpec((Bp, Hp), lambda t: (0, 0)),         # h0 (resident)
            pl.BlockSpec((Ip, 3 * Hp), lambda t: (0, 0)),     # fused W (resident)
            pl.BlockSpec((Hp, 3 * Hp), lambda t: (0, 0)),     # fused K (resident)
            pl.BlockSpec((1, 3 * Hp), lambda t: (0, 0)),
            pl.BlockSpec((1, Hp), lambda t: (0, 0)),
            pl.BlockSpec((Hp, Op), lambda t: (0, 0)),
            pl.BlockSpec((1, Op), lambda t: (0, 0)),
        ],
        out_specs=(pl.BlockSpec((1, Bp, Op), lambda t: (t, 0, 0)),
                   pl.BlockSpec((Bp, Hp), lambda t: (0, 0))),
        scratch_shapes=[pltpu.VMEM((Bp, Hp), jnp.float32)],   # h carry
        compiler_params=pltpu.CompilerParams(
            dimension_semantics=("arbitrary",),
            vmem_limit_bytes=64 * 1024 * 1024),
    )(x_p, h0_p, w_cat, k_cat, bias_cat, c_h, w_o, b_o)

    return outs_p[:, :B, :O], hlast_p[:B, :H]


# ---------------------------------------------------------------------------
# Params + pure-JAX references
# ---------------------------------------------------------------------------
def init_params(key, hidden_size, input_size, output_size):
    """Deterministic synthetic init (uniform, like torch.nn.Linear default)."""
    def linear(key, fan_in, fan_out):
        k1, k2 = jax.random.split(key)
        bound = 1.0 / jnp.sqrt(fan_in)
        w = jax.random.uniform(k1, (fan_in, fan_out), jnp.float32, -bound, bound)
        b = jax.random.uniform(k2, (1, fan_out), jnp.float32, -bound, bound)
        return w, b

    keys = jax.random.split(key, 7)
    W_u, b_u = linear(keys[0], input_size, hidden_size)
    K_u, c_u = linear(keys[1], hidden_size, hidden_size)
    W_r, b_r = linear(keys[2], input_size, hidden_size)
    K_r, c_r = linear(keys[3], hidden_size, hidden_size)
    W_h, b_h = linear(keys[4], input_size, hidden_size)
    K_h, c_h = linear(keys[5], hidden_size, hidden_size)
    W_o, b_o = linear(keys[6], hidden_size, output_size)
    return dict(W_u=W_u, b_u=b_u, K_u=K_u, c_u=c_u,
                W_r=W_r, b_r=b_r, K_r=K_r, c_r=c_r,
                W_h=W_h, b_h=b_h, K_h=K_h, c_h=c_h,
                W_o=W_o, b_o=b_o)


def gru_cell_reference(x_t, h_prev, p):
    """Pure-JAX reference matching the PyTorch forward."""
    lin = lambda a, w, b: a @ w + b
    u = jax.nn.sigmoid(lin(x_t, p["W_u"], p["b_u"]) + lin(h_prev, p["K_u"], p["c_u"]))
    r = jax.nn.sigmoid(lin(x_t, p["W_r"], p["b_r"]) + lin(h_prev, p["K_r"], p["c_r"]))
    hc = jnp.tanh(lin(x_t, p["W_h"], p["b_h"]) + r * lin(h_prev, p["K_h"], p["c_h"]))
    h_new = u * h_prev + (1.0 - u) * hc
    out = jax.nn.softmax(lin(h_new, p["W_o"], p["b_o"]), axis=1)
    return out, h_new
    # TODO(synk): h_new.detach() from the torch module is a no-op here (forward only).


def gru_sequence_reference(x_seq, h0, p):
    def step(h, x):
        out, h_new = gru_cell_reference(x, h, p)
        return h_new, out
    h_last, outs = jax.lax.scan(step, h0, x_seq)
    return outs, h_last


# ---------------------------------------------------------------------------
# Test harness
# ---------------------------------------------------------------------------
if __name__ == "__main__":
    batch_size = 4
    input_size = 16
    hidden_size = 32
    output_size = 8
    seq_len = 6

    key = jax.random.PRNGKey(0)
    k_x, k_h, k_p, k_s = jax.random.split(key, 4)
    x_t = jax.random.normal(k_x, (batch_size, input_size), jnp.float32)
    h_prev = jax.random.normal(k_h, (batch_size, hidden_size), jnp.float32)
    x_seq = jax.random.normal(k_s, (seq_len, batch_size, input_size), jnp.float32)
    params = init_params(k_p, hidden_size, input_size, output_size)

    out_ref, h_ref = gru_cell_reference(x_t, h_prev, params)

    # --- single-step, f32 weights (tight check; approx reciprocal ~1e-3) ----
    out32, h32 = gru_cell_forward(x_t, h_prev, params, weight_dtype=jnp.float32)
    jax.block_until_ready((out32, h32))
    assert out32.shape == (batch_size, output_size)
    assert h32.shape == (batch_size, hidden_size)
    assert jnp.allclose(out32, out_ref, atol=2e-3, rtol=2e-3)
    assert jnp.allclose(h32, h_ref, atol=2e-3, rtol=2e-3)
    assert jnp.allclose(jnp.sum(out32, axis=1), jnp.ones((batch_size,)), atol=2e-3)

    # --- single-step, bf16 weights (default perf path) -----------------------
    out16, h16 = gru_cell_forward(x_t, h_prev, params)
    jax.block_until_ready((out16, h16))
    assert jnp.allclose(out16, out_ref, atol=5e-2, rtol=5e-2)
    assert jnp.allclose(h16, h_ref, atol=5e-2, rtol=5e-2)
    assert jnp.allclose(jnp.sum(out16, axis=1), jnp.ones((batch_size,)), atol=5e-3)

    # --- sequence (time loop inside the kernel, weights resident) ------------
    outs_ref, hlast_ref = gru_sequence_reference(x_seq, h_prev, params)

    outs32, hlast32 = gru_sequence_forward(x_seq, h_prev, params,
                                           weight_dtype=jnp.float32)
    jax.block_until_ready((outs32, hlast32))
    assert outs32.shape == (seq_len, batch_size, output_size)
    assert hlast32.shape == (batch_size, hidden_size)
    assert jnp.allclose(outs32, outs_ref, atol=2e-3, rtol=2e-3)
    assert jnp.allclose(hlast32, hlast_ref, atol=2e-3, rtol=2e-3)

    outs16, hlast16 = gru_sequence_forward(x_seq, h_prev, params)
    jax.block_until_ready((outs16, hlast16))
    assert jnp.allclose(outs16, outs_ref, atol=1e-1, rtol=1e-1)
    assert jnp.allclose(hlast16, hlast_ref, atol=1e-1, rtol=1e-1)

    print("KERNEL_OK")
</pallas_src>

<mosaic_0001>
module attributes {stable_mosaic.version = 11 : i64} {
  func.func @_gru_cell_kernel(%arg0: i32, %arg1: memref<8x128xf32, #tpu.memory_space<vmem>>, %arg2: memref<8x128xf32, #tpu.memory_space<vmem>>, %arg3: memref<128x384xf32, #tpu.memory_space<vmem>>, %arg4: memref<128x384xf32, #tpu.memory_space<vmem>>, %arg5: memref<1x384xf32, #tpu.memory_space<vmem>>, %arg6: memref<1x128xf32, #tpu.memory_space<vmem>>, %arg7: memref<128x128xf32, #tpu.memory_space<vmem>>, %arg8: memref<1x128xf32, #tpu.memory_space<vmem>>, %arg9: memref<8x128xf32, #tpu.memory_space<vmem>>, %arg10: memref<8x128xf32, #tpu.memory_space<vmem>>) attributes {dimension_semantics = [#tpu.dimension_semantics<parallel>], iteration_bounds = array<i64: 1>, scalar_prefetch = 0 : i64, scratch_operands = 0 : i64, tpu.core_type = #tpu.core_type<tc>, window_params = [{transform_indices = @transform_0, window_bounds = array<i64: 8, 128>}, {transform_indices = @transform_1, window_bounds = array<i64: 8, 128>}, {pipeline_mode = #tpu.pipeline_mode<synchronous>, transform_indices = @transform_2, window_bounds = array<i64: 128, 384>}, {pipeline_mode = #tpu.pipeline_mode<synchronous>, transform_indices = @transform_3, window_bounds = array<i64: 128, 384>}, {pipeline_mode = #tpu.pipeline_mode<synchronous>, transform_indices = @transform_4, window_bounds = array<i64: 1, 384>}, {pipeline_mode = #tpu.pipeline_mode<synchronous>, transform_indices = @transform_5, window_bounds = array<i64: 1, 128>}, {pipeline_mode = #tpu.pipeline_mode<synchronous>, transform_indices = @transform_6, window_bounds = array<i64: 128, 128>}, {pipeline_mode = #tpu.pipeline_mode<synchronous>, transform_indices = @transform_7, window_bounds = array<i64: 1, 128>}, {transform_indices = @transform_8, window_bounds = array<i64: 8, 128>}, {transform_indices = @transform_9, window_bounds = array<i64: 8, 128>}]} {
    %c0 = arith.constant 0 : index
    %c0_0 = arith.constant 0 : index
    %0 = vector.load %arg1[%c0, %c0_0] : memref<8x128xf32, #tpu.memory_space<vmem>>, vector<8x128xf32>
    %c0_1 = arith.constant 0 : index
    %c0_2 = arith.constant 0 : index
    %1 = vector.load %arg2[%c0_1, %c0_2] : memref<8x128xf32, #tpu.memory_space<vmem>>, vector<8x128xf32>
    %c0_3 = arith.constant 0 : index
    %c0_4 = arith.constant 0 : index
    %2 = vector.load %arg3[%c0_3, %c0_4] : memref<128x384xf32, #tpu.memory_space<vmem>>, vector<128x384xf32>
    %c0_5 = arith.constant 0 : index
    %c0_6 = arith.constant 0 : index
    %3 = vector.load %arg4[%c0_5, %c0_6] : memref<128x384xf32, #tpu.memory_space<vmem>>, vector<128x384xf32>
    %c0_7 = arith.constant 0 : index
    %c0_8 = arith.constant 0 : index
    %4 = vector.load %arg5[%c0_7, %c0_8] : memref<1x384xf32, #tpu.memory_space<vmem>>, vector<1x384xf32>
    %c0_9 = arith.constant 0 : index
    %c0_10 = arith.constant 0 : index
    %5 = vector.load %arg6[%c0_9, %c0_10] : memref<1x128xf32, #tpu.memory_space<vmem>>, vector<1x128xf32>
    %c0_11 = arith.constant 0 : index
    %c0_12 = arith.constant 0 : index
    %6 = vector.load %arg7[%c0_11, %c0_12] : memref<128x128xf32, #tpu.memory_space<vmem>>, vector<128x128xf32>
    %c0_13 = arith.constant 0 : index
    %c0_14 = arith.constant 0 : index
    %7 = vector.load %arg8[%c0_13, %c0_14] : memref<1x128xf32, #tpu.memory_space<vmem>>, vector<1x128xf32>
    %cst = arith.constant dense<0.000000e+00> : vector<8x384xf32>
    %8 = tpu.matmul %0, %2, %cst {dimension_numbers = #tpu.dot_dimension_numbers<[1], [0], [0], [1], [0, 0, 1, 1], [], []>} : vector<8x128xf32>, vector<128x384xf32>, vector<8x384xf32> -> vector<8x384xf32>
    %9 = vector.broadcast %4 : vector<1x384xf32> to vector<8x384xf32>
    %10 = arith.addf %8, %9 : vector<8x384xf32>
    %cst_15 = arith.constant dense<0.000000e+00> : vector<8x384xf32>
    %11 = tpu.matmul %1, %3, %cst_15 {dimension_numbers = #tpu.dot_dimension_numbers<[1], [0], [0], [1], [0, 0, 1, 1], [], []>} : vector<8x128xf32>, vector<128x384xf32>, vector<8x384xf32> -> vector<8x384xf32>
    %12 = vector.extract_strided_slice %10 {offsets = [0, 0], sizes = [8, 128], strides = [1, 1]} : vector<8x384xf32> to vector<8x128xf32>
    %13 = vector.extract_strided_slice %11 {offsets = [0, 0], sizes = [8, 128], strides = [1, 1]} : vector<8x384xf32> to vector<8x128xf32>
    %14 = arith.addf %12, %13 : vector<8x128xf32>
    %15 = arith.negf %14 : vector<8x128xf32>
    %16 = math.exp %15 : vector<8x128xf32>
    %cst_16 = arith.constant 1.000000e+00 : f32
    %17 = vector.broadcast %cst_16 : f32 to vector<8x128xf32>
    %18 = arith.addf %17, %16 : vector<8x128xf32>
    %19 = arith.divf %17, %18 : vector<8x128xf32>
    %20 = vector.extract_strided_slice %10 {offsets = [0, 128], sizes = [8, 128], strides = [1, 1]} : vector<8x384xf32> to vector<8x128xf32>
    %21 = vector.extract_strided_slice %11 {offsets = [0, 128], sizes = [8, 128], strides = [1, 1]} : vector<8x384xf32> to vector<8x128xf32>
    %22 = arith.addf %20, %21 : vector<8x128xf32>
    %23 = arith.negf %22 : vector<8x128xf32>
    %24 = math.exp %23 : vector<8x128xf32>
    %cst_17 = arith.constant 1.000000e+00 : f32
    %25 = vector.broadcast %cst_17 : f32 to vector<8x128xf32>
    %26 = arith.addf %25, %24 : vector<8x128xf32>
    %27 = arith.divf %25, %26 : vector<8x128xf32>
    %28 = vector.extract_strided_slice %10 {offsets = [0, 256], sizes = [8, 128], strides = [1, 1]} : vector<8x384xf32> to vector<8x128xf32>
    %29 = vector.extract_strided_slice %11 {offsets = [0, 256], sizes = [8, 128], strides = [1, 1]} : vector<8x384xf32> to vector<8x128xf32>
    %30 = vector.broadcast %5 : vector<1x128xf32> to vector<8x128xf32>
    %31 = arith.addf %29, %30 : vector<8x128xf32>
    %32 = arith.mulf %27, %31 : vector<8x128xf32>
    %33 = arith.addf %28, %32 : vector<8x128xf32>
    %34 = math.tanh %33 : vector<8x128xf32>
    %35 = arith.mulf %19, %1 : vector<8x128xf32>
    %cst_18 = arith.constant 1.000000e+00 : f32
    %36 = vector.broadcast %cst_18 : f32 to vector<8x128xf32>
    %37 = arith.subf %36, %19 : vector<8x128xf32>
    %38 = arith.mulf %37, %34 : vector<8x128xf32>
    %39 = arith.addf %35, %38 : vector<8x128xf32>
    %cst_19 = arith.constant dense<0.000000e+00> : vector<8x128xf32>
    %40 = tpu.matmul %39, %6, %cst_19 {dimension_numbers = #tpu.dot_dimension_numbers<[1], [0], [0], [1], [0, 0, 1, 1], [], []>} : vector<8x128xf32>, vector<128x128xf32>, vector<8x128xf32> -> vector<8x128xf32>
    %41 = vector.broadcast %7 : vector<1x128xf32> to vector<8x128xf32>
    %42 = arith.addf %40, %41 : vector<8x128xf32>
    %43 = tpu.iota {dimensions = array<i32: 1>} : vector<8x128xi32>
    %c8_i32 = arith.constant 8 : i32
    %44 = vector.broadcast %c8_i32 : i32 to vector<8x128xi32>
    %45 = arith.cmpi slt, %43, %44 : vector<8x128xi32>
    %cst_20 = arith.constant -1.000000e+30 : f32
    %46 = vector.broadcast %cst_20 : f32 to vector<8x128xf32>
    %47 = arith.select %45, %42, %46 : vector<8x128xi1>, vector<8x128xf32>
    %cst_21 = arith.constant dense<0xFF800000> : vector<8xf32>
    %48 = vector.multi_reduction <maximumf>, %47, %cst_21 [1] : vector<8x128xf32> to vector<8xf32>
    %49 = vector.shape_cast %48 : vector<8xf32> to vector<8x1xf32>
    %50 = vector.broadcast %49 : vector<8x1xf32> to vector<8x128xf32>
    %51 = arith.subf %47, %50 : vector<8x128xf32>
    %52 = math.exp %51 : vector<8x128xf32>
    %cst_22 = arith.constant dense<0.000000e+00> : vector<8xf32>
    %53 = vector.multi_reduction <add>, %52, %cst_22 [1] : vector<8x128xf32> to vector<8xf32>
    %54 = vector.shape_cast %53 : vector<8xf32> to vector<8x1xf32>
    %55 = tpu.reciprocal %54 {approx = true} : vector<8x1xf32> -> vector<8x1xf32>
    %56 = vector.broadcast %55 : vector<8x1xf32> to vector<8x128xf32>
    %57 = arith.mulf %52, %56 : vector<8x128xf32>
    %c0_23 = arith.constant 0 : index
    %c0_24 = arith.constant 0 : index
    %58 = vector.load %arg9[%c0_23, %c0_24] : memref<8x128xf32, #tpu.memory_space<vmem>>, vector<8x128xf32>
    tpu.vector_store %arg9[%c0_23, %c0_24], %57 {strides = array<i32>} : memref<8x128xf32, #tpu.memory_space<vmem>>, vector<8x128xf32>,
    %c0_25 = arith.constant 0 : index
    %c0_26 = arith.constant 0 : index
    %59 = vector.load %arg10[%c0_25, %c0_26] : memref<8x128xf32, #tpu.memory_space<vmem>>, vector<8x128xf32>
    tpu.vector_store %arg10[%c0_25, %c0_26], %39 {strides = array<i32>} : memref<8x128xf32, #tpu.memory_space<vmem>>, vector<8x128xf32>,
    return
  }
  func.func @transform_0(%arg0: i32) -> (i32, i32) {
    %c0_i32 = arith.constant 0 : i32
    %c0_i32_0 = arith.constant 0 : i32
    return %arg0, %c0_i32 : i32, i32
  }
  func.func @transform_1(%arg0: i32) -> (i32, i32) {
    %c0_i32 = arith.constant 0 : i32
    %c0_i32_0 = arith.constant 0 : i32
    return %arg0, %c0_i32 : i32, i32
  }
  func.func @transform_2(%arg0: i32) -> (i32, i32) {
    %c0_i32 = arith.constant 0 : i32
    %c0_i32_0 = arith.constant 0 : i32
    %c0_i32_1 = arith.constant 0 : i32
    return %c0_i32, %c0_i32_0 : i32, i32
  }
  func.func @transform_3(%arg0: i32) -> (i32, i32) {
    %c0_i32 = arith.constant 0 : i32
    %c0_i32_0 = arith.constant 0 : i32
    %c0_i32_1 = arith.constant 0 : i32
    return %c0_i32, %c0_i32_0 : i32, i32
  }
  func.func @transform_4(%arg0: i32) -> (i32, i32) {
    %c0_i32 = arith.constant 0 : i32
    %c0_i32_0 = arith.constant 0 : i32
    %c0_i32_1 = arith.constant 0 : i32
    return %c0_i32, %c0_i32_0 : i32, i32
  }
  func.func @transform_5(%arg0: i32) -> (i32, i32) {
    %c0_i32 = arith.constant 0 : i32
    %c0_i32_0 = arith.constant 0 : i32
    %c0_i32_1 = arith.constant 0 : i32
    return %c0_i32, %c0_i32_0 : i32, i32
  }
  func.func @transform_6(%arg0: i32) -> (i32, i32) {
    %c0_i32 = arith.constant 0 : i32
    %c0_i32_0 = arith.constant 0 : i32
    %c0_i32_1 = arith.constant 0 : i32
    return %c0_i32, %c0_i32_0 : i32, i32
  }
  func.func @transform_7(%arg0: i32) -> (i32, i32) {
    %c0_i32 = arith.constant 0 : i32
    %c0_i32_0 = arith.constant 0 : i32
    %c0_i32_1 = arith.constant 0 : i32
    return %c0_i32, %c0_i32_0 : i32, i32
  }
  func.func @transform_8(%arg0: i32) -> (i32, i32) {
    %c0_i32 = arith.constant 0 : i32
    %c0_i32_0 = arith.constant 0 : i32
    return %arg0, %c0_i32 : i32, i32
  }
  func.func @transform_9(%arg0: i32) -> (i32, i32) {
    %c0_i32 = arith.constant 0 : i32
    %c0_i32_0 = arith.constant 0 : i32
    return %arg0, %c0_i32 : i32, i32
  }
}

</mosaic_0001>

<bundles_post_ra>
// kernel: tpu_custom_call.1
= control target key start
LH: loop header
LB: loop body
LE: loop exit
PB: predicated region body
PF: predicated region fallthrough
CT: control target
= control target key end

     0   :  { %15 = vsyncpa [#allocation3], 0  ;;  %s1153_s0 = inlined_call_operand.hbm [shape: f32[8,128], index: 0, kind: input, shape index: {}]   ;;  %s1154_s1 = inlined_call_operand.hbm [shape: f32[8,128], index: 1, kind: input, shape index: {}]   ;;  %s1155_s2 = inlined_call_operand.hbm [shape: f32[128,384], index: 2, kind: input, shape index: {}]   ;;  %s1156_s3 = inlined_call_operand.hbm [shape: f32[128,384], index: 3, kind: input, shape index: {}]   ;;  %s1157_s4 = inlined_call_operand.vmem [shape: f32[1,384], index: 4, kind: input, shape index: {}]   ;;  %s1158_s5 = inlined_call_operand.vmem [shape: f32[1,128], index: 5, kind: input, shape index: {}]   ;;  %s1159_s6 = inlined_call_operand.hbm [shape: f32[128,128], index: 6, kind: input, shape index: {}]   ;;  %s1160_s7 = inlined_call_operand.vmem [shape: f32[1,128], index: 7, kind: input, shape index: {}]   ;;  %s1161_s8 = inlined_call_operand.hbm [shape: f32[8,128], index: 8, kind: output, shape index: {0}]   ;;  %s1162_s9 = inlined_call_operand.hbm [shape: f32[8,128], index: 9, kind: output, shape index: {1}]  }
   0x1   :  { %16 = vsyncpa [#allocation6], 0 }
   0x2   :  { %17 = vsyncpa [#allocation9], 0 }
   0x3   :  { %18 = vsyncpa [#allocation4], 0 }
   0x4   :  { %19 = vsyncpa [#allocation13], 0  ;;  %s999_s30 = smov [#allocation5]  }
   0x5   :  { %s36_s10 = sshll.u32 %s999_s30, 4  ;;  %s37_s10 = int_to_ptr.vmem [resolvable:$true] %s36_s10 }
   0x6   :  { %s857_s11 = scalar_lea.vmem %s37_s10, 128  ;;  %p862_p1 = scmp.lt.s32.totalorder %s37_s10, %s37_s10 }
   0x7   :  { %p858_p0 = scmp.ne.s32.totalorder %s37_s10, %s857_s11  ;;  %p863_p2 = scmp.lt.s32.totalorder %s857_s11, %s857_s11 }
   0x9   :  { %p864_p3 = por %p863_p2, %p862_p1 }
   0xb   :  { %p865_p4 = pnand %p864_p3, %p858_p0 }
   0xd   :  { %868 = shalt.err (!%p865_p4)
}
   0xe   :  { %39 = dma.hbm_to_vmem [thread:$0]  %s1154_s1, 128, %s37_s10, [#allocation6]  }
   0xf   :  { %s1000_s14 = smov [#allocation8]   ;;  %s1001_s16 = smov [#allocation2]  }
  0x10   :  { %s57_s15 = sshll.u32 %s1000_s14, 4  ;;  %s26_s17 = sshll.u32 %s1001_s16, 4  ;;  %s58_s15 = int_to_ptr.vmem [resolvable:$true] %s57_s15  ;;  %s27_s17 = int_to_ptr.vmem [resolvable:$true] %s26_s17 }
  0x11   :  { %s877_s18 = scalar_lea.vmem %s58_s15, 6144  ;;  %p882_p6 = scmp.lt.s32.totalorder %s58_s15, %s58_s15 }
  0x12   :  { %p878_p5 = scmp.ne.s32.totalorder %s58_s15, %s877_s18  ;;  %p883_p7 = scmp.lt.s32.totalorder %s877_s18, %s877_s18 }
  0x14   :  { %p884_p8 = por %p883_p7, %p882_p6 }
  0x16   :  { %p885_p9 = pnand %p884_p8, %p878_p5 }
  0x18   :  { %888 = shalt.err (!%p885_p9)
}
  0x19   :  { %s1002_s19 = smov 384   ;;  %s1003_s20 = smov 24  }
  0x1a   :  { %63 = dma.hbm_to_vmem [thread:$0]  %s1156_s3, 6144, %s58_s15, [#allocation9], %s1002_s19, %s1002_s19, %s1003_s20  }
  0x1b   :  { %s897_s1 = scalar_lea.vmem %s27_s17, 128  ;;  %p902_p11 = scmp.lt.s32.totalorder %s27_s17, %s27_s17 }
  0x1c   :  { %p898_p10 = scmp.ne.s32.totalorder %s27_s17, %s897_s1  ;;  %p903_p12 = scmp.lt.s32.totalorder %s897_s1, %s897_s1 }
  0x1e   :  { %p904_p13 = por %p903_p12, %p902_p11 }
  0x20   :  { %p905_p0 = pnand %p904_p13, %p898_p10 }
  0x22   :  { %908 = shalt.err (!%p905_p0)
}
  0x23   :  { %29 = dma.hbm_to_vmem [thread:$0]  %s1153_s0, 128, %s27_s17, [#allocation3]  }
  0x24   :  { %s1004_s25 = smov [#allocation7]   ;;  %s1005_s27 = smov [#allocation10]  }
  0x25   :  { %s45_s26 = sshll.u32 %s1004_s25, 4  ;;  %s73_s28 = sshll.u32 %s1005_s27, 4  ;;  %s46_s26 = int_to_ptr.vmem [resolvable:$true] %s45_s26  ;;  %s74_s28 = int_to_ptr.vmem [resolvable:$true] %s73_s28 }
  0x26   :  { %s917_s29 = scalar_lea.vmem %s46_s26, 6144  ;;  %p922_p2 = scmp.lt.s32.totalorder %s46_s26, %s46_s26 }
  0x27   :  { %p918_p1 = scmp.ne.s32.totalorder %s46_s26, %s917_s29  ;;  %p923_p3 = scmp.lt.s32.totalorder %s917_s29, %s917_s29 }
  0x29   :  { %p924_p4 = por %p923_p3, %p922_p2 }
  0x2b   :  { %p925_p5 = pnand %p924_p4, %p918_p1 }
  0x2d   :  { %928 = shalt.err (!%p925_p5)
}
  0x2e   :  { %51 = dma.hbm_to_vmem [thread:$0]  %s1155_s2, 6144, %s46_s26, [#allocation6], %s1002_s19, %s1002_s19, %s1003_s20  }
  0x2f   :  { %s937_s10 = scalar_lea.vmem %s74_s28, 2048  ;;  %p942_p7 = scmp.lt.s32.totalorder %s74_s28, %s74_s28 }
  0x30   :  { %p938_p6 = scmp.ne.s32.totalorder %s74_s28, %s937_s10  ;;  %p943_p8 = scmp.lt.s32.totalorder %s937_s10, %s937_s10 }
  0x32   :  { %p944_p9 = por %p943_p8, %p942_p7 }
  0x34   :  { %p945_p10 = pnand %p944_p9, %p938_p6 }
  0x36   :  { %948 = shalt.err (!%p945_p10)
}
  0x37   :  { %s1006_s0 = smov 128   ;;  %s1007_s11 = smov 8  }
  0x38   :  { %79 = dma.hbm_to_vmem [thread:$0]  %s1159_s6, 2048, %s74_s28, [#allocation9], %s1006_s0, %s1006_s0, %s1007_s11  }
  0x39   :  { %989 = dma.done.wait [#allocation3], 128  }
  0x3a   :  { %990 = vsyncadd [#allocation3], 4294967168 }
  0x3b   :  { %991 = dma.done.wait [#allocation6], 6272  }
  0x3c   :  { %992 = vsyncadd [#allocation6], 4294961024 }
  0x3d   :  { %993 = dma.done.wait [#allocation9], 8192  }
  0x3e   :  { %994 = vsyncadd [#allocation9], 4294959104  ;;  %v1008_v0 = vmov 0.0   ;;  %vm1009_vm0 = vmmov 0   ;;  %v145_v1 = vld [vmem:[#allocation7 + $0x170] sm:$0xff]  ;;  %v144_v2 = vld [vmem:[#allocation7 + $0x168] sm:$0xff] }
  0x3f   :  { %294 = vmatprep.mubr.f32.mxu0 %v1008_v0  ;;  %717 = vmatprep.subr.mxu1 %v1008_v0  ;;  %v142_v3 = vld [vmem:[#allocation7 + $0x158] sm:$0xff]  ;;  %v141_v4 = vld [vmem:[#allocation7 + $0x150] sm:$0xff]  ;;  %v139_v5 = vld [vmem:[#allocation7 + $0x140] sm:$0xff]  ;;  %s1010_s16 = smov [#allocation12]  }
  0x40   :  { %749 = vmatprep.mubr.msk.f32.mxu1 %vm1009_vm0, %v1008_v0  ;;  %230 = vmatprep.subr.mxu0 %v145_v1  ;;  %v138_v6 = vld [vmem:[#allocation7 + $0x138] sm:$0xff]  ;;  %v136_v7 = vld [vmem:[#allocation7 + $0x128] sm:$0xff]  ;;  %v135_v8 = vld [vmem:[#allocation7 + $0x120] sm:$0xff]  ;;  %s647_s17 = sshll.u32 %s1010_s16, 4  ;;  %s648_s17 = int_to_ptr.vmem [resolvable:$true] %s647_s17 }
  0x41   :  { %231 = vmatpush1.msra.mxu0 %v144_v2  ;;  %v133_v9 = vld [vmem:[#allocation7 + $0x110] sm:$0xff]  ;;  %v132_v10 = vld [vmem:[#allocation7 + $0x108] sm:$0xff]  ;;  %v130_v11 = vld [vmem:[#allocation7 + $0xf8] sm:$0xff]  ;;  %s949_s18 = scalar_lea.vmem %s648_s17, 128  ;;  %p954_p12 = scmp.lt.s32.totalorder %s648_s17, %s648_s17 }
  0x42   :  { %232 = vmatprep.subr.mxu0 %v142_v3  ;;  %v129_v12 = vld [vmem:[#allocation7 + $0xf0] sm:$0xff]  ;;  %v127_v13 = vld [vmem:[#allocation7 + $0xe0] sm:$0xff]  ;;  %v126_v14 = vld [vmem:[#allocation7 + $0xd8] sm:$0xff]  ;;  %p950_p11 = scmp.ne.s32.totalorder %s648_s17, %s949_s18  ;;  %p955_p13 = scmp.lt.s32.totalorder %s949_s18, %s949_s18 }
  0x43   :  { %233 = vmatpush1.msra.mxu0 %v141_v4  ;;  %v146_v15 = vld [vmem:[#allocation7 + $0x178] sm:$0xff]  ;;  %v124_v16 = vld [vmem:[#allocation7 + $0xc8] sm:$0xff]  ;;  %v143_v17 = vld [vmem:[#allocation7 + $0x160] sm:$0xff] }
  0x44   :  { %234 = vmatprep.subr.mxu0 %v139_v5  ;;  %718 = vmatpush3.msra.mxu1 %v146_v15  ;;  %v123_v18 = vld [vmem:[#allocation7 + $0xc0] sm:$0xff]  ;;  %v140_v19 = vld [vmem:[#allocation7 + $0x148] sm:$0xff]  ;;  %v121_v20 = vld [vmem:[#allocation7 + $0xb0] sm:$0xff]  ;;  %p956_p0 = por %p955_p13, %p954_p12 }
  0x45   :  { %235 = vmatpush1.msra.mxu0 %v138_v6  ;;  %719 = vmatprep.subr.mxu1 %v1008_v0  ;;  %v120_v21 = vld [vmem:[#allocation7 + $0xa8] sm:$0xff]  ;;  %v137_v22 = vld [vmem:[#allocation7 + $0x130] sm:$0xff]  ;;  %v118_v23 = vld [vmem:[#allocation7 + $0x98] sm:$0xff] }
  0x46   :  { %236 = vmatprep.subr.mxu0 %v136_v7  ;;  %720 = vmatpush3.msra.mxu1 %v143_v17  ;;  %v117_v24 = vld [vmem:[#allocation7 + $0x90] sm:$0xff]  ;;  %v134_v25 = vld [vmem:[#allocation7 + $0x118] sm:$0xff]  ;;  %v115_v26 = vld [vmem:[#allocation7 + $0x80] sm:$0xff]  ;;  %p957_p1 = pnand %p956_p0, %p950_p11 }
  0x47   :  { %237 = vmatpush1.msra.mxu0 %v135_v8  ;;  %721 = vmatprep.subr.mxu1 %v1008_v0  ;;  %v114_v27 = vld [vmem:[#allocation7 + $0x78] sm:$0xff]  ;;  %v131_v28 = vld [vmem:[#allocation7 + $0x100] sm:$0xff]  ;;  %v112_v29 = vld [vmem:[#allocation7 + $0x68] sm:$0xff] }
  0x48   :  { %238 = vmatprep.subr.mxu0 %v133_v9  ;;  %722 = vmatpush3.msra.mxu1 %v140_v19  ;;  %v111_v30 = vld [vmem:[#allocation7 + $0x60] sm:$0xff]  ;;  %v128_v31 = vld [vmem:[#allocation7 + $0xe8] sm:$0xff]  ;;  %v109_v32 = vld [vmem:[#allocation7 + $0x50] sm:$0xff] }
  0x49   :  { %239 = vmatpush1.msra.mxu0 %v132_v10  ;;  %723 = vmatprep.subr.mxu1 %v1008_v0  ;;  %v108_v33 = vld [vmem:[#allocation7 + $0x48] sm:$0xff]  ;;  %v125_v34 = vld [vmem:[#allocation7 + $0xd0] sm:$0xff]  ;;  %v106_v35 = vld [vmem:[#allocation7 + $0x38] sm:$0xff] }
  0x4a   :  { %240 = vmatprep.subr.mxu0 %v130_v11  ;;  %724 = vmatpush3.msra.mxu1 %v137_v22  ;;  %v105_v36 = vld [vmem:[#allocation7 + $0x30] sm:$0xff]  ;;  %v122_v37 = vld [vmem:[#allocation7 + $0xb8] sm:$0xff]  ;;  %v103_v38 = vld [vmem:[#allocation7 + $0x20] sm:$0xff] }
  0x4b   :  { %241 = vmatpush1.msra.mxu0 %v129_v12  ;;  %725 = vmatprep.subr.mxu1 %v1008_v0  ;;  %v102_v39 = vld [vmem:[#allocation7 + $0x18] sm:$0xff]  ;;  %v119_v40 = vld [vmem:[#allocation7 + $0xa0] sm:$0xff]  ;;  %v100_v41 = vld [vmem:[#allocation7 + $0x8] sm:$0xff] }
  0x4c   :  { %242 = vmatprep.subr.mxu0 %v127_v13  ;;  %726 = vmatpush3.msra.mxu1 %v134_v25  ;;  %v99_v42 = vld [vmem:[#allocation7] sm:$0xff]  ;;  %v116_v43 = vld [vmem:[#allocation7 + $0x88] sm:$0xff]  ;;  %v97_v44 = vld [vmem:[#allocation2] sm:$0xff] }
  0x4d   :  { %243 = vmatpush1.msra.mxu0 %v126_v14  ;;  %727 = vmatprep.subr.mxu1 %v1008_v0  ;;  %v193_v45 = vld [vmem:[#allocation8 + $0x170] sm:$0xff]  ;;  %v192_v46 = vld [vmem:[#allocation8 + $0x168] sm:$0xff]  ;;  %v190_v47 = vld [vmem:[#allocation8 + $0x158] sm:$0xff] }
  0x4e   :  { %244 = vmatprep.subr.mxu0 %v124_v16  ;;  %728 = vmatpush3.msra.mxu1 %v131_v28  ;;  %v113_v48 = vld [vmem:[#allocation7 + $0x70] sm:$0xff]  ;;  %v187_v50 = vld [vmem:[#allocation8 + $0x140] sm:$0xff]  ;;  %v110_v51 = vld [vmem:[#allocation7 + $0x58] sm:$0xff] }
  0x4f   :  { %245 = vmatpush1.msra.mxu0 %v123_v18  ;;  %729 = vmatprep.subr.mxu1 %v1008_v0  ;;  %v189_v49 = vld [vmem:[#allocation8 + $0x150] sm:$0xff]  ;;  %v186_v52 = vld [vmem:[#allocation8 + $0x138] sm:$0xff]  ;;  %v184_v53 = vld [vmem:[#allocation8 + $0x128] sm:$0xff] }
  0x50   :  { %246 = vmatprep.subr.mxu0 %v121_v20  ;;  %730 = vmatpush3.msra.mxu1 %v128_v31  ;;  %v107_v54 = vld [vmem:[#allocation7 + $0x40] sm:$0xff]  ;;  %v181_v56 = vld [vmem:[#allocation8 + $0x110] sm:$0xff]  ;;  %v104_v57 = vld [vmem:[#allocation7 + $0x28] sm:$0xff] }
  0x51   :  { %247 = vmatpush1.msra.mxu0 %v120_v21  ;;  %731 = vmatprep.subr.mxu1 %v1008_v0  ;;  %v183_v55 = vld [vmem:[#allocation8 + $0x120] sm:$0xff]  ;;  %v180_v58 = vld [vmem:[#allocation8 + $0x108] sm:$0xff]  ;;  %v178_v59 = vld [vmem:[#allocation8 + $0xf8] sm:$0xff] }
  0x52   :  { %248 = vmatprep.subr.mxu0 %v118_v23  ;;  %732 = vmatpush3.msra.mxu1 %v125_v34  ;;  %v101_v60 = vld [vmem:[#allocation7 + $0x10] sm:$0xff]  ;;  %v175_v62 = vld [vmem:[#allocation8 + $0xe0] sm:$0xff]  ;;  %v174_v63 = vld [vmem:[#allocation8 + $0xd8] sm:$0xff] }
  0x53   :  { %249 = vmatpush1.msra.mxu0 %v117_v24  ;;  %733 = vmatprep.subr.mxu1 %v1008_v0  ;;  %v177_v61 = vld [vmem:[#allocation8 + $0xf0] sm:$0xff]  ;;  %v172_v1 = vld [vmem:[#allocation8 + $0xc8] sm:$0xff]  ;;  %v194_v2 = vld [vmem:[#allocation8 + $0x178] sm:$0xff] }
  0x54   :  { %250 = vmatprep.subr.mxu0 %v115_v26  ;;  %734 = vmatpush3.msra.mxu1 %v122_v37  ;;  %v171_v3 = vld [vmem:[#allocation8 + $0xc0] sm:$0xff]  ;;  %v169_v4 = vld [vmem:[#allocation8 + $0xb0] sm:$0xff]  ;;  %v168_v6 = vld [vmem:[#allocation8 + $0xa8] sm:$0xff] }
  0x55   :  { %251 = vmatpush1.msra.mxu0 %v114_v27  ;;  %735 = vmatprep.subr.mxu1 %v1008_v0  ;;  %v191_v5 = vld [vmem:[#allocation8 + $0x160] sm:$0xff]  ;;  %v166_v7 = vld [vmem:[#allocation8 + $0x98] sm:$0xff]  ;;  %v188_v8 = vld [vmem:[#allocation8 + $0x148] sm:$0xff] }
  0x56   :  { %252 = vmatprep.subr.mxu0 %v112_v29  ;;  %736 = vmatpush3.msra.mxu1 %v119_v40  ;;  %v165_v9 = vld [vmem:[#allocation8 + $0x90] sm:$0xff]  ;;  %v163_v10 = vld [vmem:[#allocation8 + $0x80] sm:$0xff]  ;;  %v162_v12 = vld [vmem:[#allocation8 + $0x78] sm:$0xff] }
  0x57   :  { %253 = vmatpush1.msra.mxu0 %v111_v30  ;;  %737 = vmatprep.subr.mxu1 %v1008_v0  ;;  %v185_v11 = vld [vmem:[#allocation8 + $0x130] sm:$0xff]  ;;  %v160_v13 = vld [vmem:[#allocation8 + $0x68] sm:$0xff]  ;;  %v182_v14 = vld [vmem:[#allocation8 + $0x118] sm:$0xff] }
  0x58   :  { %254 = vmatprep.subr.mxu0 %v109_v32  ;;  %738 = vmatpush3.msra.mxu1 %v116_v43  ;;  %v159_v15 = vld [vmem:[#allocation8 + $0x60] sm:$0xff]  ;;  %v157_v16 = vld [vmem:[#allocation8 + $0x50] sm:$0xff]  ;;  %v156_v18 = vld [vmem:[#allocation8 + $0x48] sm:$0xff] }
  0x59   :  { %255 = vmatpush1.msra.mxu0 %v108_v33  ;;  %739 = vmatprep.subr.mxu1 %v1008_v0  ;;  %v179_v17 = vld [vmem:[#allocation8 + $0x100] sm:$0xff]  ;;  %v154_v19 = vld [vmem:[#allocation8 + $0x38] sm:$0xff]  ;;  %v176_v20 = vld [vmem:[#allocation8 + $0xe8] sm:$0xff] }
  0x5a   :  { %256 = vmatprep.subr.mxu0 %v106_v35  ;;  %740 = vmatpush3.msra.mxu1 %v113_v48  ;;  %v153_v21 = vld [vmem:[#allocation8 + $0x30] sm:$0xff]  ;;  %v151_v22 = vld [vmem:[#allocation8 + $0x20] sm:$0xff]  ;;  %v150_v24 = vld [vmem:[#allocation8 + $0x18] sm:$0xff] }
  0x5b   :  { %257 = vmatpush1.msra.mxu0 %v105_v36  ;;  %741 = vmatprep.subr.mxu1 %v1008_v0  ;;  %v173_v23 = vld [vmem:[#allocation8 + $0xd0] sm:$0xff]  ;;  %v148_v25 = vld [vmem:[#allocation8 + $0x8] sm:$0xff]  ;;  %v170_v26 = vld [vmem:[#allocation8 + $0xb8] sm:$0xff] }
  0x5c   :  { %258 = vmatprep.subr.mxu0 %v103_v38  ;;  %742 = vmatpush3.msra.mxu1 %v110_v51  ;;  %v147_v27 = vld [vmem:[#allocation8] sm:$0xff]  ;;  %v1105_v28 = vld [vmem:[#allocation5] sm:$0xff]  ;;  %v164_v30 = vld [vmem:[#allocation8 + $0x88] sm:$0xff] }
  0x5d   :  { %259 = vmatpush1.msra.mxu0 %v102_v39  ;;  %743 = vmatprep.subr.mxu1 %v1008_v0  ;;  %v167_v29 = vld [vmem:[#allocation8 + $0xa0] sm:$0xff]  ;;  %v161_v31 = vld [vmem:[#allocation8 + $0x70] sm:$0xff]  ;;  %v158_v32 = vld [vmem:[#allocation8 + $0x58] sm:$0xff] }
  0x5e   :  { %260 = vmatprep.subr.mxu0 %v100_v41  ;;  %744 = vmatpush3.msra.mxu1 %v107_v54  ;;  %v155_v33 = vld [vmem:[#allocation8 + $0x40] sm:$0xff]  ;;  %v152_v34 = vld [vmem:[#allocation8 + $0x28] sm:$0xff]  ;;  %v149_v35 = vld [vmem:[#allocation8 + $0x10] sm:$0xff]  ;;  %v215_v54 = vlaneseq }
  0x5f   :  { %261 = vmatpush1.msra.mxu0 %v99_v42  ;;  %745 = vmatprep.subr.mxu1 %v1008_v0  ;;  %v212_v36 = vld [vmem:[#allocation10 + $0x78] sm:$0xff]  ;;  %v211_v37 = vld [vmem:[#allocation10 + $0x70] sm:$0xff]  ;;  %v210_v38 = vld [vmem:[#allocation10 + $0x68] sm:$0xff] }
  0x60   :  { %295 = vmatmul.mubr.f32.vlgmr.msra.gmra.mxu0 %v97_v44  ;;  %371 = vmatprep.subr.mxu0 %v193_v45  ;;  %v209_v39 = vld [vmem:[#allocation10 + $0x60] sm:$0xff]  ;;  %v208_v40 = vld [vmem:[#allocation10 + $0x58] sm:$0xff]  ;;  %v207_v41 = vld [vmem:[#allocation10 + $0x50] sm:$0xff] }
  0x61   :  { %372 = vmatpush1.msra.mxu0 %v192_v46  ;;  %746 = vmatpush3.msra.mxu1 %v104_v57  ;;  %v206_v42 = vld [vmem:[#allocation10 + $0x48] sm:$0xff]  ;;  %v205_v43 = vld [vmem:[#allocation10 + $0x40] sm:$0xff]  ;;  %v203_v45 = vld [vmem:[#allocation10 + $0x30] sm:$0xff] }
  0x62   :  { %373 = vmatprep.subr.mxu0 %v190_v47  ;;  %747 = vmatprep.subr.mxu1 %v1008_v0  ;;  %v202_v46 = vld [vmem:[#allocation10 + $0x28] sm:$0xff]  ;;  %v201_v47 = vld [vmem:[#allocation10 + $0x20] sm:$0xff]  ;;  %v200_v48 = vld [vmem:[#allocation10 + $0x18] sm:$0xff] }
  0x63   :  { %374 = vmatpush1.msra.mxu0 %v189_v49  ;;  %748 = vmatpush3.msra.mxu1 %v101_v60  ;;  %v199_v49 = vld [vmem:[#allocation10 + $0x10] sm:$0xff]  ;;  %v197_v51 = vld [vmem:[#allocation10] sm:$0xff] }
  0x64   :  { %375 = vmatprep.subr.mxu0 %v187_v50  ;;  %435 = vmatprep.mubr.f32.mxu0 %v1008_v0  ;;  %v198_v50 = vld [vmem:[#allocation10 + $0x8] sm:$0xff]  ;;  %v195_v57 = vld [vmem:[%s1157_s4] sm:$0x7] }
  0x65   :  { %376 = vmatpush1.msra.mxu0 %v186_v52  ;;  %752 = vmatprep.subr.mxu1 %v1008_v0 }
  0x66   :  { %377 = vmatprep.subr.mxu0 %v184_v53  ;;  %750 = vmatmul.mubr.f32.vlgmr.msra.gmra.mxu1 %v97_v44  ;;  %v204_v44 = vld [vmem:[#allocation10 + $0x38] sm:$0xff] }
  0x67   :  { %378 = vmatpush1.msra.mxu0 %v183_v55  ;;  %753 = vmatpush3.msra.mxu1 %v194_v2  ;;  %v216_v55 = vshrl.u32 %v215_v54, 7 }
  0x68   :  { %379 = vmatprep.subr.mxu0 %v181_v56  ;;  %754 = vmatprep.subr.mxu1 %v1008_v0 }
  0x69   :  { %380 = vmatpush1.msra.mxu0 %v180_v58  ;;  %755 = vmatpush3.msra.mxu1 %v191_v5  ;;  %v221_v56 = vsub.s32 1, %v216_v55 }
  0x6a   :  { %381 = vmatprep.subr.mxu0 %v178_v59  ;;  %756 = vmatprep.subr.mxu1 %v1008_v0 }
  0x6b   :  { %382 = vmatpush1.msra.mxu0 %v177_v61  ;;  %757 = vmatpush3.msra.mxu1 %v188_v8  ;;  %v222_v59 = vrot.slane %v195_v57, %v221_v56  ;;  %v217_v61 = vsub.s32 0, %v216_v55 }
  0x6c   :  { %383 = vmatprep.subr.mxu0 %v175_v62  ;;  %758 = vmatprep.subr.mxu1 %v1008_v0 }
  0x6d   :  { %384 = vmatpush1.msra.mxu0 %v174_v63  ;;  %759 = vmatpush3.msra.mxu1 %v185_v11  ;;  %v218_v2 = vrot.slane %v195_v57, %v217_v61  ;;  %v225_v11 = vsub.s32 2, %v216_v55 }
  0x6e   :  { %385 = vmatprep.subr.mxu0 %v172_v1  ;;  %760 = vmatprep.subr.mxu1 %v1008_v0 }
  0x6f   :  { %386 = vmatpush1.msra.mxu0 %v171_v3  ;;  %761 = vmatpush3.msra.mxu1 %v182_v14 }
  0x70   :  { %387 = vmatprep.subr.mxu0 %v169_v4  ;;  %762 = vmatprep.subr.mxu1 %v1008_v0 }
  0x71   :  { %388 = vmatpush1.msra.mxu0 %v168_v6  ;;  %763 = vmatpush3.msra.mxu1 %v179_v17 }
  0x72   :  { %389 = vmatprep.subr.mxu0 %v166_v7  ;;  %764 = vmatprep.subr.mxu1 %v1008_v0 }
  0x73   :  { %390 = vmatpush1.msra.mxu0 %v165_v9  ;;  %765 = vmatpush3.msra.mxu1 %v176_v20 }
  0x74   :  { %391 = vmatprep.subr.mxu0 %v163_v10  ;;  %766 = vmatprep.subr.mxu1 %v1008_v0 }
  0x75   :  { %392 = vmatpush1.msra.mxu0 %v162_v12  ;;  %767 = vmatpush3.msra.mxu1 %v173_v23 }
  0x76   :  { %393 = vmatprep.subr.mxu0 %v160_v13  ;;  %768 = vmatprep.subr.mxu1 %v1008_v0  ;;  %v664_v13 = vld [vmem:[%s1158_s5] ss:$0 sm:$0xff] }
  0x77   :  { %394 = vmatpush1.msra.mxu0 %v159_v15  ;;  %769 = vmatpush3.msra.mxu1 %v170_v26  ;;  %v226_v15 = vrot.slane %v195_v57, %v225_v11 }
  0x78   :  { %395 = vmatprep.subr.mxu0 %v157_v16  ;;  %770 = vmatprep.subr.mxu1 %v1008_v0 }
  0x79   :  { %396 = vmatpush1.msra.mxu0 %v156_v18  ;;  %771 = vmatpush3.msra.mxu1 %v167_v29  ;;  %v665_v29 = vld [vmem:[%s1160_s7] ss:$0 sm:$0xff] }
  0x7a   :  { %397 = vmatprep.subr.mxu0 %v154_v19  ;;  %772 = vmatprep.subr.mxu1 %v1008_v0 }
  0x7b   :  { %398 = vmatpush1.msra.mxu0 %v153_v21  ;;  %784 = vmatprep.mubr.msk.f32.mxu1 %vm1009_vm0, %v1008_v0 }
  0x7c   :  { %399 = vmatprep.subr.mxu0 %v151_v22  ;;  %773 = vmatpush3.msra.mxu1 %v164_v30 }
  0x7d   :  { %400 = vmatpush1.msra.mxu0 %v150_v24  ;;  %774 = vmatprep.subr.mxu1 %v1008_v0 }
  0x7e   :  { %401 = vmatprep.subr.mxu0 %v148_v25  ;;  %775 = vmatpush3.msra.mxu1 %v161_v31 }
  0x7f   :  { %402 = vmatpush1.msra.mxu0 %v147_v27  ;;  %776 = vmatprep.subr.mxu1 %v1008_v0  ;;  %v617_v27 = vand.u32 127, %v215_v54 }
  0x80   :  { %436 = vmatmul.mubr.f32.vlgmr.msra.gmra.mxu0 %v1105_v28  ;;  %787 = vmatprep.subr.mxu0 %v1008_v0 }
  0x81   :  { %819 = vmatprep.mubr.msk.f32.mxu0 %vm1009_vm0, %v1008_v0  ;;  %777 = vmatpush3.msra.mxu1 %v158_v32  ;;  %vm618_vm1 = vcmp.lt.s32.totalorder %v617_v27, 8 }
  0x82   :  { %778 = vmatprep.subr.mxu1 %v1008_v0  ;;  %788 = vmatpush3.msra.mxu0 %v212_v36 }
  0x83   :  { %779 = vmatpush3.msra.mxu1 %v155_v33  ;;  %789 = vmatprep.subr.mxu0 %v1008_v0 }
  0x84   :  { %780 = vmatprep.subr.mxu1 %v1008_v0  ;;  %790 = vmatpush3.msra.mxu0 %v211_v37 }
  0x85   :  { %781 = vmatpush3.msra.mxu1 %v152_v34  ;;  %791 = vmatprep.subr.mxu0 %v1008_v0 }
  0x86   :  { %782 = vmatprep.subr.mxu1 %v1008_v0  ;;  %792 = vmatpush3.msra.mxu0 %v210_v38 }
  0x87   :  { %783 = vmatpush3.msra.mxu1 %v149_v35  ;;  %793 = vmatprep.subr.mxu0 %v1008_v0 }
  0x88   :  { %785 = vmatmul.mubr.f32.vlgmr.msra.gmra.mxu1 %v1105_v28  ;;  %794 = vmatpush3.msra.mxu0 %v209_v39 }
  0x89   :  { %795 = vmatprep.subr.mxu0 %v1008_v0 }
  0x8a   :  { %796 = vmatpush3.msra.mxu0 %v208_v40 }
  0x8b   :  { %797 = vmatprep.subr.mxu0 %v1008_v0 }
  0x8c   :  { %798 = vmatpush3.msra.mxu0 %v207_v41 }
  0x8d   :  { %799 = vmatprep.subr.mxu0 %v1008_v0 }
  0x8e   :  { %800 = vmatpush3.msra.mxu0 %v206_v42 }
  0x8f   :  { %801 = vmatprep.subr.mxu0 %v1008_v0 }
  0x90   :  { %802 = vmatpush3.msra.mxu0 %v205_v43 }
  0x91   :  { %803 = vmatprep.subr.mxu0 %v1008_v0 }
  0x92   :  { %804 = vmatpush3.msra.mxu0 %v204_v44 }
  0x93   :  { %805 = vmatprep.subr.mxu0 %v1008_v0 }
  0x94   :  { %806 = vmatpush3.msra.mxu0 %v203_v45 }
  0x95   :  { %807 = vmatprep.subr.mxu0 %v1008_v0 }
  0x96   :  { %808 = vmatpush3.msra.mxu0 %v202_v46 }
  0x97   :  { %809 = vmatprep.subr.mxu0 %v1008_v0 }
  0x98   :  { %810 = vmatpush3.msra.mxu0 %v201_v47 }
  0x99   :  { %811 = vmatprep.subr.mxu0 %v1008_v0 }
  0x9a   :  { %812 = vmatpush3.msra.mxu0 %v200_v48 }
  0x9b   :  { %813 = vmatprep.subr.mxu0 %v1008_v0 }
  0x9c   :  { %814 = vmatpush3.msra.mxu0 %v199_v49 }
  0x9d   :  { %815 = vmatprep.subr.mxu0 %v1008_v0 }
  0x9e   :  { %816 = vmatpush3.msra.mxu0 %v198_v50 }
  0x9f   :  { %817 = vmatprep.subr.mxu0 %v1008_v0 }
  0xa0   :  { %818 = vmatpush3.msra.mxu0 %v197_v51 }
 0x120   :  { %v296_v58 = vpop.f32.mrf.mxu0 }
 0x121   :  { %v297_v4 = vadd.f32 %v296_v58, %v218_v2 }
 0x122   :  { %v298_v60 = vpop.f32.mrf.mxu0 }
 0x123   :  { %v299_v63 = vadd.f32 %v298_v60, %v222_v59 }
 0x126   :  { %v367_v52 = vpop.f32.mrf.mxu1 }
 0x127   :  { %v368_v18 = vadd.f32 %v367_v52, %v226_v15 }
 0x128   :  { %v751_v53 = vpop.f32.mrf.mxu1 }
 0x140   :  { %v437_v62 = vpop.f32.mrf.mxu0 }
 0x141   :  { %v512_v5 = vadd.f32 %v437_v62, %v297_v4 }
 0x142   :  { %v439_v1 = vpop.f32.mrf.mxu0 }
 0x143   :  { %v519_v3 = vadd.f32 %v439_v1, %v299_v63  ;;  %v662_v6 = vmul.f32 -1.442695, %v512_v5 }
 0x145   :  { %v663_v0 = vmul.f32 -1.442695, %v519_v3 }
 0x147   :  { %835 = vpow2.f32 %v663_v0 }
 0x148   :  { %v508_v7 = vpop.f32.mrf.mxu1  ;;  %837 = vpow2.f32 %v662_v6 }
 0x149   :  { %v532_v16 = vadd.f32 %v664_v13, %v508_v7 }
 0x14a   :  { %v786_v8 = vpop.f32.mrf.mxu1 }
 0x154   :  { %v836_v9 = vpop.eup %835 }
 0x155   :  { %v523_v10 = vadd.f32 1.0, %v836_v9  ;;  %v838_v12 = vpop.eup %837 }
 0x156   :  { %v516_v14 = vadd.f32 1.0, %v838_v12 }
 0x157   :  { %839 = vrcp.f32 %v523_v10 }
 0x158   :  { %841 = vrcp.f32 %v516_v14 }
 0x164   :  { %v840_v17 = vpop.eup %839 }
 0x165   :  { %v533_v19 = vmul.f32 %v840_v17, %v532_v16  ;;  %v842_v21 = vpop.eup %841 }
 0x166   :  { %v537_v22 = vsub.f32 1.0, %v842_v21  ;;  %v536_v24 = vmul.f32 %v842_v21, %v1105_v28 }
 0x167   :  { %v534_v20 = vadd.f32 %v533_v19, %v368_v18 }
 0x169   :  { %843 = vtanh.f32 %v534_v20 }
 0x176   :  { %v844_v23 = vpop.eup %843 }
 0x177   :  { %v538_v25 = vmul.f32 %v844_v23, %v537_v22 }
 0x179   :  { %v539_v26 = vadd.f32 %v538_v25, %v536_v24 }
 0x17b   :  { %820 = vmatmul.mubr.f32.vlgmr.msra.gmra.mxu0 %v539_v26  ;;  %630 = vst [vmem:[#allocation12] sm:$0xff] %v539_v26 }
 0x23b   :  { %v612_v30 = vpop.f32.mrf.mxu0 }
 0x23c   :  { %v613_v31 = vadd.f32 %v665_v29, %v612_v30 }
 0x23d   :  { %v821_v32 = vpop.f32.mrf.mxu0 }
 0x23e   :  { %v619_v33 = vsel %vm618_vm1, %v613_v31, -1e+30 }
 0x23f   :  { %620 = vmax.xlane.f32.xlu0 %v619_v33 }
 0x2c8   :  { %v621_v34 = vpop.xlane.xlu0 %620 }
 0x2c9   :  { %v622_v35 = vsub.f32 %v619_v33, %v621_v34 }
 0x2cb   :  { %v623_v36 = vmul.f32 1.442695, %v622_v35 }
 0x2cd   :  { %845 = vpow2.f32 %v623_v36 }
 0x2da   :  { %v846_v28 = vpop.eup %845 }
 0x2db   :  { %625 = vadd.xlane.f32.xlu0 %v846_v28 }
 0x2dc   :  { %960 = shalt.err (!%p957_p1)
}
 0x2dd   :  { %650 = dma.vmem_to_hbm [thread:$0]  %s648_s17, 128, %s1162_s9, [#allocation13]  }
 0x2de   :  { %s1011_s20 = smov [#allocation11]  }
 0x2df   :  { %s637_s21 = sshll.u32 %s1011_s20, 4  ;;  %s638_s21 = int_to_ptr.vmem [resolvable:$true] %s637_s21 }
 0x2e0   :  { %s969_s22 = scalar_lea.vmem %s638_s21, 128  ;;  %p974_p3 = scmp.lt.s32.totalorder %s638_s21, %s638_s21 }
 0x2e1   :  { %p970_p2 = scmp.ne.s32.totalorder %s638_s21, %s969_s22  ;;  %p975_p4 = scmp.lt.s32.totalorder %s969_s22, %s969_s22 }
 0x2e3   :  { %p976_p5 = por %p975_p4, %p974_p3 }
 0x2e5   :  { %p977_p6 = pnand %p976_p5, %p970_p2 }
 0x364   :  { %v626_v37 = vpop.xlane.xlu0 %625 }
 0x365   :  { %847 = vrcp.f32 %v626_v37 }
 0x372   :  { %v848_v38 = vpop.eup %847 }
 0x373   :  { %v628_v39 = vmul.f32 %v848_v38, %v846_v28 }
 0x375   :  { %629 = vst [vmem:[#allocation11] sm:$0xff] %v628_v39 }
 0x376   :  { %980 = shalt.err (!%p977_p6)
}
 0x377   :  { %640 = dma.vmem_to_hbm [thread:$0]  %s638_s21, 128, %s1161_s8, [#allocation4]  }
 0x378   :  { %995 = dma.done.wait [#allocation4], 128  }
 0x379   :  { %996 = vsyncadd [#allocation4], 4294967168 }
 0x37a   :  { %997 = dma.done.wait [#allocation13], 128  }
 0x37b   :  { %998 = vsyncadd [#allocation13], 4294967168 }
 0x37c   :  { %657 = vsyncpa [#allocation3], 1 }
 0x37d   :  { %658 = vsyncpa [#allocation6], 1 }
 0x37e   :  { %659 = vsyncpa [#allocation9], 1 }
 0x37f   :  { %660 = vsyncpa [#allocation4], 1 }
 0x380   :  { %661 = vsyncpa [#allocation13], 1 }

</bundles_post_ra>
